<compile_context>
chip_gen: v7x
topology: tpu7x:2x2x1
jax: 0.10.0
libtpu: 0.0.40
codegen_flags: <defaults>
</compile_context>

<pallas_src>
import functools
import math
import random

import jax
import jax.numpy as jnp
from jax import lax
from jax.experimental import pallas as pl
from jax.experimental.pallas import tpu as pltpu


def _round_up(x, m):
    return ((x + m - 1) // m) * m


def _pick_vmem_limit():
    try:
        kind = jax.devices()[0].device_kind.lower()
    except Exception:
        return 48 * 1024 * 1024
    if ('v7' in kind) or ('7x' in kind):
        return 48 * 1024 * 1024
    if any(v in kind for v in ('v4', 'v5', 'v6')):
        return 96 * 1024 * 1024
    return 48 * 1024 * 1024


_VMEM_LIMIT = _pick_vmem_limit()


# ------------------------------------------------------------------ generic tiled matmul
def _matmul_kernel(a_ref, b_ref, bias_ref, o_ref, acc_ref):
    @pl.when(pl.program_id(2) == 0)
    def _():
        acc_ref[...] = jnp.zeros_like(acc_ref)

    acc_ref[...] += jnp.dot(a_ref[...], b_ref[...], preferred_element_type=jnp.float32)

    @pl.when(pl.program_id(2) == pl.num_programs(2) - 1)
    def _():
        o_ref[...] = (acc_ref[...] + bias_ref[...]).astype(o_ref.dtype)


def pallas_matmul(a, b, bias=None):
    """(M,K) @ (K,N) + bias — bf16 MXU operands, f32 accumulation, tiled + pipelined."""
    M, K = a.shape
    _, N = b.shape
    if bias is None:
        bias = jnp.zeros((N,), jnp.float32)
    tm = min(256, _round_up(M, 16))
    tn = min(512, _round_up(N, 128))
    tk = min(512, _round_up(K, 128))
    Mp, Np, Kp = _round_up(M, tm), _round_up(N, tn), _round_up(K, tk)
    a_p = jnp.pad(a.astype(jnp.bfloat16), ((0, Mp - M), (0, Kp - K)))
    b_p = jnp.pad(b.astype(jnp.bfloat16), ((0, Kp - K), (0, Np - N)))
    bias_p = jnp.pad(bias.astype(jnp.float32).reshape(1, N), ((0, 0), (0, Np - N)))
    out = pl.pallas_call(
        _matmul_kernel,
        out_shape=jax.ShapeDtypeStruct((Mp, Np), jnp.float32),
        grid=(Mp // tm, Np // tn, Kp // tk),
        in_specs=[pl.BlockSpec((tm, tk), lambda i, j, k: (i, k)),
                  pl.BlockSpec((tk, tn), lambda i, j, k: (k, j)),
                  pl.BlockSpec((1, tn), lambda i, j, k: (0, j))],
        out_specs=pl.BlockSpec((tm, tn), lambda i, j, k: (i, j)),
        scratch_shapes=[pltpu.VMEM((tm, tn), jnp.float32)],
        compiler_params=pltpu.CompilerParams(
            dimension_semantics=("parallel", "parallel", "arbitrary"),
            vmem_limit_bytes=_VMEM_LIMIT),
    )(a_p, b_p, bias_p)
    return out[:M, :N]


# ------------------------------------------------------------------ fused snake + conv1d (time-tiled)
def _conv1d_kernel(x_ref, w_ref, b_ref, a_ref, o_ref, *,
                   n_taps, cin, dilation, tt, halo, snake, fold):
    # x_ref: (Tpad, Cin) bf16 (full time for this batch element, resident in VMEM);
    # w_ref: (n_taps, Cin, Coutp) bf16; b_ref: (1, Coutp) f32; a_ref: (1, Cin) f32;
    # o_ref: (tt, Coutp) bf16/f32 — lane-dense time tile.
    t = pl.program_id(1)
    start = pl.multiple_of(t * tt, 8)
    xw = x_ref[pl.ds(start, tt + halo), :].astype(jnp.float32)
    if snake:
        alpha = a_ref[...]
        sn = jnp.sin(alpha * xw)
        xw = xw + sn * sn / (alpha + 1e-9)          # exact divide (matches torch Snake)
    xb = xw.astype(jnp.bfloat16)
    coutp = o_ref.shape[-1]
    if fold and n_taps > 1:
        # Fold taps into the contraction dim (deeper MXU pass) when lanes are aligned.
        pieces = [xb[k * dilation:k * dilation + tt, :] for k in range(n_taps)]
        a_cat = jnp.concatenate(pieces, axis=1)
        acc = jnp.dot(a_cat, w_ref[...].reshape(n_taps * cin, coutp),
                      preferred_element_type=jnp.float32)
    else:
        acc = jnp.dot(xb[0:tt, :], w_ref[0], preferred_element_type=jnp.float32)
        for k in range(1, n_taps):                   # static unroll over kernel taps
            acc += jnp.dot(xb[k * dilation:k * dilation + tt, :], w_ref[k],
                           preferred_element_type=jnp.float32)
    o_ref[...] = (acc + b_ref[...]).astype(o_ref.dtype)


def conv1d_lane_dense(x, wk, bp, alpha_vec, t_out, n_taps, cin, dilation, snake,
                      out_dtype=jnp.bfloat16):
    """Stride-1 conv on time-major x (B, Tp, cin) with prepared weights wk (taps, cin, Coutp)."""
    B, Tp, Cin = x.shape
    assert Cin == cin
    Coutp = wk.shape[-1]
    TT = min(256, _round_up(t_out, 16))
    nT = -(-t_out // TT)
    halo = (n_taps - 1) * dilation
    t_need = nT * TT + halo
    if Tp < t_need:
        x = jnp.pad(x, ((0, 0), (0, t_need - Tp), (0, 0)))
    elif Tp > t_need:
        x = x[:, :t_need, :]
    ap = alpha_vec.reshape(1, cin).astype(jnp.float32)
    fold = (cin % 128 == 0) and (n_taps > 1)
    kern = functools.partial(_conv1d_kernel, n_taps=n_taps, cin=cin, dilation=dilation,
                             tt=TT, halo=halo, snake=snake, fold=fold)
    out = pl.pallas_call(
        kern,
        out_shape=jax.ShapeDtypeStruct((B, nT * TT, Coutp), out_dtype),
        grid=(B, nT),
        in_specs=[pl.BlockSpec((None, t_need, cin), lambda b, t: (b, 0, 0)),
                  pl.BlockSpec(wk.shape, lambda b, t: (0, 0, 0)),
                  pl.BlockSpec((1, Coutp), lambda b, t: (0, 0)),
                  pl.BlockSpec((1, cin), lambda b, t: (0, 0))],
        out_specs=pl.BlockSpec((None, TT, Coutp), lambda b, t: (b, t, 0)),
        compiler_params=pltpu.CompilerParams(
            dimension_semantics=("parallel", "parallel"),
            vmem_limit_bytes=_VMEM_LIMIT),
    )(x.astype(jnp.bfloat16), wk, bp, ap)
    return out


def apply_sconv(L, x, cfg, alpha=None):
    """SConv1d (encodec asymmetric padding) on time-major x, optionally fusing Snake."""
    stride, dilation, K = L['stride'], L['dilation'], L['K']
    cin, cout = L['cin'], L['cout']
    eff_k = (K - 1) * dilation + 1
    pt = eff_k - stride
    B, T, _ = x.shape
    n_frames = (T - eff_k + pt) / stride + 1
    ideal = (math.ceil(n_frames) - 1) * stride + (eff_k - pt)
    extra = max(int(ideal - T), 0)
    if cfg['causal']:
        pad_l, pad_r = pt, extra
    else:
        pr = pt // 2
        pad_l, pad_r = pt - pr, pr + extra
    mode = 'reflect' if cfg['pad_mode'] == 'reflect' else 'constant'
    if mode == 'reflect':
        assert max(pad_l, pad_r) < T, "reflect padding wider than time axis"
    if pad_l > 0 or pad_r > 0:
        x = jnp.pad(x, ((0, 0), (pad_l, pad_r), (0, 0)), mode=mode)
    Tp = x.shape[1]
    t_out = (Tp - eff_k) // stride + 1

    snake = alpha is not None
    if stride == 1:
        alpha_vec = alpha if snake else jnp.ones((cin,), jnp.float32)
        out = conv1d_lane_dense(x, L['wk'], L['bp'], alpha_vec, t_out,
                                L['taps'], cin, dilation, snake)
    else:
        # Polyphase: strided conv -> stride-1 conv over stride*Cin super-channels.
        s = stride
        Kc = L['Kc']
        t_need = (t_out - 1) * s + Kc
        if t_need > Tp:
            x = jnp.pad(x, ((0, 0), (0, t_need - Tp), (0, 0)))
        elif t_need < Tp:
            x = x[:, :t_need, :]
        x = x.reshape(B, t_need // s, s * cin)
        base = alpha if snake else jnp.ones((cin,), jnp.float32)
        alpha_vec = jnp.tile(base, (s,))
        out = conv1d_lane_dense(x, L['wk'], L['bp'], alpha_vec, t_out,
                                L['taps'], L['cin_eff'], 1, snake)
    return out[:, :t_out, :cout]


def apply_sconvtr(L, x, cfg, alpha=None):
    """SConvTranspose1d as a stride-1 polyphase conv (phases live on the lane axis)."""
    s, K, J = L['stride'], L['K'], L['J']
    cin, cout, pp = L['cin'], L['cout'], L['pp']
    B, T, _ = x.shape
    l_full = (T - 1) * s + K
    x = jnp.pad(x, ((0, 0), (J - 1, J - 1), (0, 0)))   # zero halo = "no contribution"
    q_len = T + J - 1
    snake = alpha is not None
    alpha_vec = alpha if snake else jnp.ones((cin,), jnp.float32)
    out = conv1d_lane_dense(x, L['wk'], L['bp'], alpha_vec, q_len, J, cin, 1, snake)
    out = out[:, :q_len, :s * cout].reshape(B, q_len * s, cout)
    y = out[:, :l_full, :]
    pt = K - s
    if cfg['causal']:
        pr = math.ceil(pt * cfg['trim_right_ratio'])
        pl_ = pt - pr
    else:
        pr = pt // 2
        pl_ = pt - pr
    return y[:, pl_:l_full - pr, :]


# ------------------------------------------------------------------ standalone snake (fallback)
def _snake_kernel(x_ref, a_ref, o_ref):
    x = x_ref[...]
    a = a_ref[...]
    s = jnp.sin(a * x)
    o_ref[...] = x + s * s / (a + 1e-9)


def apply_snake(alpha, x):
    """Standalone Snake — only used when a snake is not followed by a conv/convtr."""
    B, T, C = x.shape
    M = B * T
    tm = min(512, _round_up(M, 8))
    Mp = _round_up(M, tm)
    xf = jnp.pad(x.reshape(M, C).astype(jnp.float32), ((0, Mp - M), (0, 0)))
    out = pl.pallas_call(
        _snake_kernel,
        out_shape=jax.ShapeDtypeStruct((Mp, C), jnp.float32),
        grid=(Mp // tm,),
        in_specs=[pl.BlockSpec((tm, C), lambda i: (i, 0)),
                  pl.BlockSpec((1, C), lambda i: (0, 0))],
        out_specs=pl.BlockSpec((tm, C), lambda i: (i, 0)),
        compiler_params=pltpu.CompilerParams(dimension_semantics=("parallel",)),
    )(xf, alpha.reshape(1, C).astype(jnp.float32))
    return out[:M].reshape(B, T, C).astype(x.dtype)


# ------------------------------------------------------------------ LSTM (blocked fused time loop)
def _lstm_seq_kernel(xp_ref, whh_ref, y_ref, h_ref, c_ref, *, tt, hdim, unroll):
    @pl.when(pl.program_id(0) == 0)
    def _():
        h_ref[...] = jnp.zeros_like(h_ref)
        c_ref[...] = jnp.zeros_like(c_ref)

    whh = whh_ref[...]                       # (H, 4H) bf16, resident

    def sig(v):
        return 1.0 / (1.0 + jnp.exp(-v))

    def step(t, carry):
        xp_t = xp_ref[t]                     # (B, 4H) f32 pre-activations
        g = xp_t + jnp.dot(h_ref[...].astype(jnp.bfloat16), whh,
                           preferred_element_type=jnp.float32)
        gi = sig(g[:, 0:hdim])
        gf = sig(g[:, hdim:2 * hdim])
        gg = jnp.tanh(g[:, 2 * hdim:3 * hdim])
        go = sig(g[:, 3 * hdim:4 * hdim])
        c_new = gf * c_ref[...] + gi * gg
        h_new = go * jnp.tanh(c_new)
        h_ref[...] = h_new
        c_ref[...] = c_new
        y_ref[t] = h_new
        return carry

    lax.fori_loop(0, tt, step, 0, unroll=unroll)


def apply_slstm(L, x):
    """SLSTM on time-major x (B, T, C): TT timesteps per grid step, h/c live in VMEM scratch."""
    B, T, C = x.shape
    xt = jnp.transpose(x, (1, 0, 2)).astype(jnp.float32)          # (T, B, C)
    h_in = xt
    for lp in L['layers']:
        H = lp['H']
        Cin = h_in.shape[2]
        xp = pallas_matmul(h_in.reshape(T * B, Cin), lp['W_ih_T'], bias=lp['bias'])
        xp = xp.reshape(T, B, 4 * H)
        TTL = min(32, T)
        T_pad = _round_up(T, TTL)
        if T_pad > T:
            xp = jnp.pad(xp, ((0, T_pad - T), (0, 0), (0, 0)))
        kern = functools.partial(_lstm_seq_kernel, tt=TTL, hdim=H, unroll=(TTL <= 16))
        y = pl.pallas_call(
            kern,
            out_shape=jax.ShapeDtypeStruct((T_pad, B, H), jnp.float32),
            grid=(T_pad // TTL,),
            in_specs=[pl.BlockSpec((TTL, B, 4 * H), lambda t: (t, 0, 0)),
                      pl.BlockSpec((H, 4 * H), lambda t: (0, 0))],
            out_specs=pl.BlockSpec((TTL, B, H), lambda t: (t, 0, 0)),
            scratch_shapes=[pltpu.VMEM((B, H), jnp.float32),
                            pltpu.VMEM((B, H), jnp.float32)],
            compiler_params=pltpu.CompilerParams(
                dimension_semantics=("arbitrary",),
                vmem_limit_bytes=_VMEM_LIMIT),
        )(xp, lp['Whh_T'])
        h_in = y[:T]
    y = h_in + xt
    return jnp.transpose(y, (1, 0, 2)).astype(jnp.bfloat16)


# ------------------------------------------------------------------ layer orchestration
def apply_resblock(L, x, cfg):
    y = apply_layers(L['block'], x, cfg)
    sc = apply_sconv(L['shortcut'], x, cfg) if L['shortcut'] is not None else x
    return (sc + y).astype(jnp.bfloat16)


def apply_layers(layers, x, cfg):
    i = 0
    n = len(layers)
    while i < n:
        L = layers[i]
        t = L['type']
        if t == 'snake' and i + 1 < n and layers[i + 1]['type'] in ('conv', 'convtr'):
            nxt = layers[i + 1]
            if nxt['type'] == 'conv':
                x = apply_sconv(nxt, x, cfg, alpha=L['alpha'])
            else:
                x = apply_sconvtr(nxt, x, cfg, alpha=L['alpha'])
            i += 2
        elif t == 'snake':
            x = apply_snake(L['alpha'], x)
            i += 1
        elif t == 'conv':
            x = apply_sconv(L, x, cfg)
            i += 1
        elif t == 'convtr':
            x = apply_sconvtr(L, x, cfg)
            i += 1
        elif t == 'resblock':
            x = apply_resblock(L, x, cfg)
            i += 1
        elif t == 'lstm':
            x = apply_slstm(L, x)
            i += 1
        else:
            raise ValueError(t)
    return x


# ------------------------------------------------------------------ residual VQ (fused)
def _rvq_layer_kernel(z_ref, qa_ref, inw_ref, inb_ref, cb_ref, ee_ref, outw_ref, outb_ref,
                      qa_out_ref, res_out_ref, sq_ref, *, n_valid, t_rows):
    i = pl.program_id(0)
    z = z_ref[...]                                                        # (tr, Dp)
    ze = jnp.dot(z, inw_ref[...], preferred_element_type=jnp.float32) + inb_ref[...]
    dist = ee_ref[...] - 2.0 * jax.lax.dot_general(
        ze, cb_ref[...], (((1,), (1,)), ((), ())),
        preferred_element_type=jnp.float32)                               # (tr, binsp)
    nbins = dist.shape[1]
    bin_iota = jax.lax.broadcasted_iota(jnp.float32, dist.shape, 1)
    min_d = jnp.min(dist, axis=1, keepdims=True)
    idx = jnp.min(jnp.where(dist <= min_d, bin_iota, float(nbins)),
                  axis=1, keepdims=True)                                  # first-min index
    onehot = (bin_iota == idx).astype(jnp.float32)
    zq = jnp.dot(onehot, cb_ref[...], preferred_element_type=jnp.float32)  # (tr, dcbp)

    diff = zq - ze
    row = jax.lax.broadcasted_iota(jnp.int32, diff.shape, 0) + i * t_rows
    diff = jnp.where(row < n_valid, diff, 0.0)                            # mask padded rows
    part = jnp.sum(jnp.sum(diff * diff, axis=1, keepdims=True), axis=0, keepdims=True)

    @pl.when(i == 0)
    def _():
        sq_ref[...] = jnp.zeros_like(sq_ref)
    sq_ref[...] += part

    q = jnp.dot(zq, outw_ref[...], preferred_element_type=jnp.float32) + outb_ref[...]
    qa_out_ref[...] = qa_ref[...] + q
    res_out_ref[...] = z - q


def apply_quantizer(qp, x, frame_rate, bandwidth):
    """Residual VQ (DAC style, euclidean codebooks) on time-major x (B, T, D)."""
    B, T, D = x.shape
    bw_per_q = math.log2(qp['bins']) * frame_rate / 1000.0
    n_q = qp['n_q']
    if bandwidth is not None and bandwidth > 0.0:
        n_q = min(qp['n_q'], max(1, int(math.floor(bandwidth / bw_per_q))))
    # TODO(synk): quantizer_dropout (random per-sample n_q) is a training-time stochastic op; skipped.
    M = B * T
    Dp = qp['Dp']
    tr = min(256, _round_up(M, 8))
    Mp = _round_up(M, tr)
    residual = jnp.pad(x.reshape(M, D).astype(jnp.float32), ((0, Mp - M), (0, Dp - D)))
    qacc = jnp.zeros((Mp, Dp), jnp.float32)
    losses = []
    for layer in qp['layers'][:n_q]:
        binsp, dcbp = layer['cb'].shape
        kern = functools.partial(_rvq_layer_kernel, n_valid=M, t_rows=tr)
        qacc, residual, sq = pl.pallas_call(
            kern,
            out_shape=(jax.ShapeDtypeStruct((Mp, Dp), jnp.float32),
                       jax.ShapeDtypeStruct((Mp, Dp), jnp.float32),
                       jax.ShapeDtypeStruct((1, 1), jnp.float32)),
            grid=(Mp // tr,),
            in_specs=[pl.BlockSpec((tr, Dp), lambda i: (i, 0)),
                      pl.BlockSpec((tr, Dp), lambda i: (i, 0)),
                      pl.BlockSpec((Dp, dcbp), lambda i: (0, 0)),
                      pl.BlockSpec((1, dcbp), lambda i: (0, 0)),
                      pl.BlockSpec((binsp, dcbp), lambda i: (0, 0)),
                      pl.BlockSpec((1, binsp), lambda i: (0, 0)),
                      pl.BlockSpec((dcbp, Dp), lambda i: (0, 0)),
                      pl.BlockSpec((1, Dp), lambda i: (0, 0))],
            out_specs=(pl.BlockSpec((tr, Dp), lambda i: (i, 0)),
                       pl.BlockSpec((tr, Dp), lambda i: (i, 0)),
                       pl.BlockSpec((1, 1), lambda i: (0, 0))),
            compiler_params=pltpu.CompilerParams(
                dimension_semantics=("arbitrary",),
                vmem_limit_bytes=_VMEM_LIMIT),
        )(residual, qacc, layer['in_w'], layer['in_b'], layer['cb'], layer['ee'],
          layer['out_w'], layer['out_b'])
        # commitment vs codebook loss only differ by detach placement (grad-time) ->
        # a single forward MSE serves both.
        losses.append(sq[0, 0] / float(M * qp['dcb']))
    loss = jnp.mean(jnp.stack(losses))
    return qacc[:M, :D].reshape(B, T, D), loss, loss


# ------------------------------------------------------------------ parameter builders (raw)
class KeyGen:
    def __init__(self, key):
        self.key = key

    def __call__(self):
        self.key, sub = jax.random.split(self.key)
        return sub


def _normal(kg, shape, scale=0.05):
    return scale * jax.random.normal(kg(), shape, jnp.float32)


def make_conv(kg, cin, cout, k, stride=1, dilation=1):
    # weight_norm is identity at init -> plain weights.
    return {'type': 'conv', 'w': _normal(kg, (cout, cin, k)),
            'b': jnp.zeros((cout,), jnp.float32), 'stride': stride, 'dilation': dilation}


def make_convtr(kg, cin, cout, k, stride=1):
    return {'type': 'convtr', 'w': _normal(kg, (cin, cout, k)),
            'b': jnp.zeros((cout,), jnp.float32), 'stride': stride}


def make_snake(channels):
    return {'type': 'snake', 'alpha': jnp.ones((channels,), jnp.float32)}


def make_lstm(kg, dim, num_layers):
    layers = [{'W_ih': _normal(kg, (4 * dim, dim)), 'W_hh': _normal(kg, (4 * dim, dim)),
               'b_ih': jnp.zeros((4 * dim,), jnp.float32),
               'b_hh': jnp.zeros((4 * dim,), jnp.float32)} for _ in range(num_layers)]
    return {'type': 'lstm', 'layers': layers}


def make_resblock(kg, dim, kernel_sizes, dilations, cfg):
    hidden = dim // cfg['compress']
    n = len(kernel_sizes)
    block = []
    for i, (k, d) in enumerate(zip(kernel_sizes, dilations)):
        in_chs = dim if i == 0 else hidden
        out_chs = dim if i == n - 1 else hidden
        block.append(make_snake(in_chs))
        block.append(make_conv(kg, in_chs, out_chs, k, stride=1, dilation=d))
    shortcut = None if cfg['true_skip'] else make_conv(kg, dim, dim, 1)
    return {'type': 'resblock', 'block': block, 'shortcut': shortcut}


def build_encoder(kg, cfg):
    nf, ratios = cfg['n_filters'], cfg['ratios']
    mult = 1
    layers = [make_conv(kg, cfg['channels'], mult * nf, cfg['kernel_size'])]
    for ratio in reversed(ratios):
        for j in range(cfg['n_residual_layers']):
            layers.append(make_resblock(kg, mult * nf, [cfg['residual_kernel_size'], 1],
                                        [cfg['dilation_base'] ** j, 1], cfg))
        layers.append(make_snake(mult * nf))
        layers.append(make_conv(kg, mult * nf, mult * nf * 2, ratio * 2, stride=ratio))
        mult *= 2
    if cfg['lstm'] > 0:
        layers.append(make_lstm(kg, mult * nf, cfg['lstm']))
    layers.append(make_snake(mult * nf))
    layers.append(make_conv(kg, mult * nf, cfg['hidden_dim'], cfg['last_kernel_size']))
    return layers


def build_decoder(kg, cfg):
    nf, ratios = cfg['n_filters'], cfg['ratios']
    mult = 2 ** len(ratios)
    layers = [make_conv(kg, cfg['hidden_dim'], mult * nf, cfg['kernel_size'])]
    if cfg['lstm'] > 0:
        layers.append(make_lstm(kg, mult * nf, cfg['lstm']))
    for ratio in ratios:
        layers.append(make_snake(mult * nf))
        layers.append(make_convtr(kg, mult * nf, mult * nf // 2, ratio * 2, stride=ratio))
        for j in range(cfg['n_residual_layers']):
            layers.append(make_resblock(kg, mult * nf // 2, [cfg['residual_kernel_size'], 1],
                                        [cfg['dilation_base'] ** j, 1], cfg))
        mult //= 2
    layers.append(make_snake(nf))
    layers.append(make_conv(kg, nf, cfg['channels'], cfg['last_kernel_size']))
    return layers


def build_quantizer(kg, cfg):
    D, dcb, bins = cfg['hidden_dim'], cfg['codebook_dim'], cfg['bins']
    layers = []
    for _ in range(cfg['n_q']):
        layers.append({'in_w': _normal(kg, (dcb, D)), 'in_b': jnp.zeros((dcb,), jnp.float32),
                       'codebook': jax.random.normal(kg(), (bins, dcb), jnp.float32),
                       'out_w': _normal(kg, (D, dcb)), 'out_b': jnp.zeros((D,), jnp.float32)})
    # TODO(synk): k-means codebook init / EMA updates / dead-code expiry are stateful training ops.
    return {'layers': layers, 'n_q': cfg['n_q'], 'bins': bins}


# ------------------------------------------------------------------ weight preparation (one-time)
def prepare_conv(L):
    w, b, stride, dilation = L['w'], L['b'], L['stride'], L['dilation']
    Cout, Cin, K = w.shape
    Coutp = _round_up(Cout, 128)
    if stride == 1:
        taps, cin_eff, Kc = K, Cin, K
        wk3 = jnp.transpose(w, (2, 1, 0))                               # (K, Cin, Cout)
    else:
        assert dilation == 1
        s = stride
        Kc = _round_up(K, s)
        wp = jnp.pad(w, ((0, 0), (0, 0), (0, Kc - K)))
        w2 = jnp.transpose(wp.reshape(Cout, Cin, Kc // s, s), (0, 3, 1, 2))
        w2 = w2.reshape(Cout, s * Cin, Kc // s)                         # polyphase weights
        wk3 = jnp.transpose(w2, (2, 1, 0))                              # (Kc//s, s*Cin, Cout)
        taps, cin_eff = Kc // s, s * Cin
    wk = jnp.pad(wk3, ((0, 0), (0, 0), (0, Coutp - Cout))).astype(jnp.bfloat16)
    bp = jnp.pad(b.reshape(1, Cout), ((0, 0), (0, Coutp - Cout))).astype(jnp.float32)
    return {'type': 'conv', 'wk': wk, 'bp': bp, 'stride': stride, 'dilation': dilation,
            'K': K, 'Kc': Kc, 'taps': taps, 'cin': Cin, 'cout': Cout, 'cin_eff': cin_eff}


def prepare_convtr(L):
    w, b, s = L['w'], L['b'], L['stride']                               # w: (Cin, Cout, K)
    Cin, Cout, K = w.shape
    J = -(-K // s)
    w_pad = jnp.pad(w, ((0, 0), (0, 0), (0, J * s - K)))
    w_r = w_pad.reshape(Cin, Cout, J, s)
    Wt = jnp.transpose(w_r, (2, 0, 3, 1))[::-1]                         # (J, Cin, s, Cout)
    Wt = Wt.reshape(J, Cin, s * Cout)
    pp = _round_up(s * Cout, 128)
    wk = jnp.pad(Wt, ((0, 0), (0, 0), (0, pp - s * Cout))).astype(jnp.bfloat16)
    b2 = jnp.pad(jnp.tile(b, (s,)).reshape(1, s * Cout),
                 ((0, 0), (0, pp - s * Cout))).astype(jnp.float32)
    return {'type': 'convtr', 'wk': wk, 'bp': b2, 'stride': s, 'K': K, 'J': J,
            'cin': Cin, 'cout': Cout, 'pp': pp}


def prepare_lstm(L):
    layers = []
    for lp in L['layers']:
        H = lp['W_hh'].shape[1]
        layers.append({'W_ih_T': lp['W_ih'].T.astype(jnp.bfloat16),
                       'bias': (lp['b_ih'] + lp['b_hh']).astype(jnp.float32),
                       'Whh_T': lp['W_hh'].T.astype(jnp.bfloat16),      # (H, 4H), gates i,f,g,o
                       'H': H})
    return {'type': 'lstm', 'layers': layers}


def prepare_layers(layers):
    out = []
    for L in layers:
        t = L['type']
        if t == 'conv':
            out.append(prepare_conv(L))
        elif t == 'convtr':
            out.append(prepare_convtr(L))
        elif t == 'snake':
            out.append(L)
        elif t == 'lstm':
            out.append(prepare_lstm(L))
        elif t == 'resblock':
            out.append({'type': 'resblock',
                        'block': prepare_layers(L['block']),
                        'shortcut': (prepare_conv(L['shortcut'])
                                     if L['shortcut'] is not None else None)})
        else:
            raise ValueError(t)
    return out


def prepare_quantizer(raw, cfg):
    D, dcb, bins = cfg['hidden_dim'], cfg['codebook_dim'], cfg['bins']
    Dp, dcbp, binsp = _round_up(D, 128), _round_up(dcb, 128), _round_up(bins, 128)
    layers = []
    for lp in raw['layers']:
        cb = jnp.pad(lp['codebook'].astype(jnp.float32),
                     ((0, binsp - bins), (0, dcbp - dcb)))
        ee = jnp.sum(cb * cb, axis=1).reshape(1, binsp)
        if binsp > bins:
            ee = ee.at[:, bins:].set(1e30)                               # padded bins never win
        in_w = jnp.pad(lp['in_w'].T.astype(jnp.float32), ((0, Dp - D), (0, dcbp - dcb)))
        in_b = jnp.pad(lp['in_b'].reshape(1, dcb).astype(jnp.float32), ((0, 0), (0, dcbp - dcb)))
        out_w = jnp.pad(lp['out_w'].T.astype(jnp.float32), ((0, dcbp - dcb), (0, Dp - D)))
        out_b = jnp.pad(lp['out_b'].reshape(1, D).astype(jnp.float32), ((0, 0), (0, Dp - D)))
        layers.append({'cb': cb, 'ee': ee, 'in_w': in_w, 'in_b': in_b,
                       'out_w': out_w, 'out_b': out_b})
    return {'layers': layers, 'n_q': raw['n_q'], 'bins': bins, 'dcb': dcb, 'Dp': Dp}


# ------------------------------------------------------------------ forward
def dac_forward(params, cfg, x, bandwidth, use_dual_decoder=False):
    """x: (B, channels, T) -> (resyn_audio, commit_loss, quantization_loss, resyn_real)."""
    xt = jnp.transpose(x, (0, 2, 1))                                     # time-major (B, T, C)
    encoder_out = apply_layers(params['encoder'], xt, cfg)
    quantized, commit_loss, quantization_loss = apply_quantizer(
        params['quantizer'], encoder_out.astype(jnp.float32), cfg['frame_rate'], bandwidth)
    resyn = apply_layers(params['decoder'], quantized.astype(jnp.bfloat16), cfg)
    resyn_audio = jnp.transpose(resyn, (0, 2, 1)).astype(jnp.float32)
    resyn_audio_real = None
    if use_dual_decoder:
        resyn_audio_real = jnp.transpose(
            apply_layers(params['decoder'], encoder_out, cfg), (0, 2, 1)).astype(jnp.float32)
    return resyn_audio, commit_loss, quantization_loss, resyn_audio_real


# ------------------------------------------------------------------ main
if __name__ == "__main__":
    random.seed(0)

    # Small, structure-preserving configuration of DACGenerator.
    cfg = dict(
        sample_rate=800, channels=1, hidden_dim=32, n_filters=8,
        n_residual_layers=1, ratios=[4, 2], kernel_size=7,
        residual_kernel_size=7, last_kernel_size=7, dilation_base=2,
        causal=False, pad_mode='reflect', true_skip=False, compress=2,
        lstm=2, trim_right_ratio=1.0,
        codebook_dim=8, n_q=4, bins=64,
        target_bandwidths=[7.5, 15.0],
    )
    cfg['frame_rate'] = math.ceil(cfg['sample_rate'] / math.prod(cfg['ratios']))

    key = jax.random.PRNGKey(0)
    pkey, xkey = jax.random.split(key)
    kg = KeyGen(pkey)
    raw_params = {'encoder': build_encoder(kg, cfg),
                  'quantizer': build_quantizer(kg, cfg),
                  'decoder': build_decoder(kg, cfg)}
    # One-time weight preparation (transpose/pad/bf16) — hoisted out of the forward pass.
    params = {'encoder': prepare_layers(raw_params['encoder']),
              'quantizer': prepare_quantizer(raw_params['quantizer'], cfg),
              'decoder': prepare_layers(raw_params['decoder'])}

    B, T = 2, 64
    x = jax.random.normal(xkey, (B, cfg['channels'], T), jnp.float32)

    # Bandwidth choice uses the host RNG (seeded) OUTSIDE any traced code.
    bw = cfg['target_bandwidths'][random.randint(0, len(cfg['target_bandwidths']) - 1)]

    resyn_audio, commit_loss, quantization_loss, resyn_real = dac_forward(
        params, cfg, x, bw, use_dual_decoder=False)
    jax.block_until_ready((resyn_audio, commit_loss, quantization_loss))

    assert resyn_audio.shape == (B, cfg['channels'], T)
    assert commit_loss.shape == () and quantization_loss.shape == ()
    assert resyn_real is None
    print("KERNEL_OK")
</pallas_src>

<mosaic_0001>
module attributes {stable_mosaic.version = 11 : i64} {
  func.func @_conv1d_kernel(%arg0: i32, %arg1: i32, %arg2: memref<1x70x1xbf16, #tpu.memory_space<vmem>>, %arg3: memref<7x1x128xbf16, #tpu.memory_space<vmem>>, %arg4: memref<1x128xf32, #tpu.memory_space<vmem>>, %arg5: memref<1x1xf32, #tpu.memory_space<vmem>>, %arg6: memref<1x64x128xbf16, #tpu.memory_space<vmem>>) attributes {dimension_semantics = [#tpu.dimension_semantics<parallel>, #tpu.dimension_semantics<parallel>], iteration_bounds = array<i64: 2, 1>, scalar_prefetch = 0 : i64, scratch_operands = 0 : i64, tpu.core_type = #tpu.core_type<tc>, window_params = [{transform_indices = @transform_0, window_bounds = array<i64: 1, 70, 1>}, {pipeline_mode = #tpu.pipeline_mode<synchronous>, transform_indices = @transform_1, window_bounds = array<i64: 7, 1, 128>}, {pipeline_mode = #tpu.pipeline_mode<synchronous>, transform_indices = @transform_2, window_bounds = array<i64: 1, 128>}, {pipeline_mode = #tpu.pipeline_mode<synchronous>, transform_indices = @transform_3, window_bounds = array<i64: 1, 1>}, {transform_indices = @transform_4, window_bounds = array<i64: 1, 64, 128>}]} {
    %c64_i32 = arith.constant 64 : i32
    %0 = arith.muli %arg1, %c64_i32 : i32
    %1 = tpu.assume_multiple %0, 8 : i32
    %c0 = arith.constant 0 : index
    %2 = arith.index_cast %1 : i32 to index
    %c0_0 = arith.constant 0 : index
    %3 = vector.load %arg2[%c0, %2, %c0_0] : memref<1x70x1xbf16, #tpu.memory_space<vmem>>, vector<1x70x1xbf16>
    %4 = vector.shape_cast %3 : vector<1x70x1xbf16> to vector<70x1xbf16>
    %5 = arith.extf %4 : vector<70x1xbf16> to vector<70x1xf32>
    %6 = arith.truncf %5 : vector<70x1xf32> to vector<70x1xbf16>
    %7 = vector.extract_strided_slice %6 {offsets = [0, 0], sizes = [64, 1], strides = [1, 1]} : vector<70x1xbf16> to vector<64x1xbf16>
    %c0_1 = arith.constant 0 : index
    %c0_2 = arith.constant 0 : index
    %c0_3 = arith.constant 0 : index
    %8 = vector.load %arg3[%c0_1, %c0_2, %c0_3] : memref<7x1x128xbf16, #tpu.memory_space<vmem>>, vector<1x1x128xbf16>
    %9 = vector.shape_cast %8 : vector<1x1x128xbf16> to vector<1x128xbf16>
    %cst = arith.constant dense<0.000000e+00> : vector<64x128xf32>
    %10 = tpu.matmul %7, %9, %cst {dimension_numbers = #tpu.dot_dimension_numbers<[1], [0], [0], [1], [0, 0, 1, 1], [], []>} : vector<64x1xbf16>, vector<1x128xbf16>, vector<64x128xf32> -> vector<64x128xf32>
    %11 = vector.extract_strided_slice %6 {offsets = [1, 0], sizes = [64, 1], strides = [1, 1]} : vector<70x1xbf16> to vector<64x1xbf16>
    %c1 = arith.constant 1 : index
    %c0_4 = arith.constant 0 : index
    %c0_5 = arith.constant 0 : index
    %12 = vector.load %arg3[%c1, %c0_4, %c0_5] : memref<7x1x128xbf16, #tpu.memory_space<vmem>>, vector<1x1x128xbf16>
    %13 = vector.shape_cast %12 : vector<1x1x128xbf16> to vector<1x128xbf16>
    %cst_6 = arith.constant dense<0.000000e+00> : vector<64x128xf32>
    %14 = tpu.matmul %11, %13, %cst_6 {dimension_numbers = #tpu.dot_dimension_numbers<[1], [0], [0], [1], [0, 0, 1, 1], [], []>} : vector<64x1xbf16>, vector<1x128xbf16>, vector<64x128xf32> -> vector<64x128xf32>
    %15 = arith.addf %10, %14 : vector<64x128xf32>
    %16 = vector.extract_strided_slice %6 {offsets = [2, 0], sizes = [64, 1], strides = [1, 1]} : vector<70x1xbf16> to vector<64x1xbf16>
    %c2 = arith.constant 2 : index
    %c0_7 = arith.constant 0 : index
    %c0_8 = arith.constant 0 : index
    %17 = vector.load %arg3[%c2, %c0_7, %c0_8] : memref<7x1x128xbf16, #tpu.memory_space<vmem>>, vector<1x1x128xbf16>
    %18 = vector.shape_cast %17 : vector<1x1x128xbf16> to vector<1x128xbf16>
    %cst_9 = arith.constant dense<0.000000e+00> : vector<64x128xf32>
    %19 = tpu.matmul %16, %18, %cst_9 {dimension_numbers = #tpu.dot_dimension_numbers<[1], [0], [0], [1], [0, 0, 1, 1], [], []>} : vector<64x1xbf16>, vector<1x128xbf16>, vector<64x128xf32> -> vector<64x128xf32>
    %20 = arith.addf %15, %19 : vector<64x128xf32>
    %21 = vector.extract_strided_slice %6 {offsets = [3, 0], sizes = [64, 1], strides = [1, 1]} : vector<70x1xbf16> to vector<64x1xbf16>
    %c3 = arith.constant 3 : index
    %c0_10 = arith.constant 0 : index
    %c0_11 = arith.constant 0 : index
    %22 = vector.load %arg3[%c3, %c0_10, %c0_11] : memref<7x1x128xbf16, #tpu.memory_space<vmem>>, vector<1x1x128xbf16>
    %23 = vector.shape_cast %22 : vector<1x1x128xbf16> to vector<1x128xbf16>
    %cst_12 = arith.constant dense<0.000000e+00> : vector<64x128xf32>
    %24 = tpu.matmul %21, %23, %cst_12 {dimension_numbers = #tpu.dot_dimension_numbers<[1], [0], [0], [1], [0, 0, 1, 1], [], []>} : vector<64x1xbf16>, vector<1x128xbf16>, vector<64x128xf32> -> vector<64x128xf32>
    %25 = arith.addf %20, %24 : vector<64x128xf32>
    %26 = vector.extract_strided_slice %6 {offsets = [4, 0], sizes = [64, 1], strides = [1, 1]} : vector<70x1xbf16> to vector<64x1xbf16>
    %c4 = arith.constant 4 : index
    %c0_13 = arith.constant 0 : index
    %c0_14 = arith.constant 0 : index
    %27 = vector.load %arg3[%c4, %c0_13, %c0_14] : memref<7x1x128xbf16, #tpu.memory_space<vmem>>, vector<1x1x128xbf16>
    %28 = vector.shape_cast %27 : vector<1x1x128xbf16> to vector<1x128xbf16>
    %cst_15 = arith.constant dense<0.000000e+00> : vector<64x128xf32>
    %29 = tpu.matmul %26, %28, %cst_15 {dimension_numbers = #tpu.dot_dimension_numbers<[1], [0], [0], [1], [0, 0, 1, 1], [], []>} : vector<64x1xbf16>, vector<1x128xbf16>, vector<64x128xf32> -> vector<64x128xf32>
    %30 = arith.addf %25, %29 : vector<64x128xf32>
    %31 = vector.extract_strided_slice %6 {offsets = [5, 0], sizes = [64, 1], strides = [1, 1]} : vector<70x1xbf16> to vector<64x1xbf16>
    %c5 = arith.constant 5 : index
    %c0_16 = arith.constant 0 : index
    %c0_17 = arith.constant 0 : index
    %32 = vector.load %arg3[%c5, %c0_16, %c0_17] : memref<7x1x128xbf16, #tpu.memory_space<vmem>>, vector<1x1x128xbf16>
    %33 = vector.shape_cast %32 : vector<1x1x128xbf16> to vector<1x128xbf16>
    %cst_18 = arith.constant dense<0.000000e+00> : vector<64x128xf32>
    %34 = tpu.matmul %31, %33, %cst_18 {dimension_numbers = #tpu.dot_dimension_numbers<[1], [0], [0], [1], [0, 0, 1, 1], [], []>} : vector<64x1xbf16>, vector<1x128xbf16>, vector<64x128xf32> -> vector<64x128xf32>
    %35 = arith.addf %30, %34 : vector<64x128xf32>
    %36 = vector.extract_strided_slice %6 {offsets = [6, 0], sizes = [64, 1], strides = [1, 1]} : vector<70x1xbf16> to vector<64x1xbf16>
    %c6 = arith.constant 6 : index
    %c0_19 = arith.constant 0 : index
    %c0_20 = arith.constant 0 : index
    %37 = vector.load %arg3[%c6, %c0_19, %c0_20] : memref<7x1x128xbf16, #tpu.memory_space<vmem>>, vector<1x1x128xbf16>
    %38 = vector.shape_cast %37 : vector<1x1x128xbf16> to vector<1x128xbf16>
    %cst_21 = arith.constant dense<0.000000e+00> : vector<64x128xf32>
    %39 = tpu.matmul %36, %38, %cst_21 {dimension_numbers = #tpu.dot_dimension_numbers<[1], [0], [0], [1], [0, 0, 1, 1], [], []>} : vector<64x1xbf16>, vector<1x128xbf16>, vector<64x128xf32> -> vector<64x128xf32>
    %40 = arith.addf %35, %39 : vector<64x128xf32>
    %c0_22 = arith.constant 0 : index
    %c0_23 = arith.constant 0 : index
    %41 = vector.load %arg4[%c0_22, %c0_23] : memref<1x128xf32, #tpu.memory_space<vmem>>, vector<1x128xf32>
    %42 = vector.broadcast %41 : vector<1x128xf32> to vector<64x128xf32>
    %43 = arith.addf %40, %42 : vector<64x128xf32>
    %44 = arith.truncf %43 : vector<64x128xf32> to vector<64x128xbf16>
    %c0_24 = arith.constant 0 : index
    %c0_25 = arith.constant 0 : index
    %c0_26 = arith.constant 0 : index
    %45 = vector.load %arg6[%c0_24, %c0_25, %c0_26] : memref<1x64x128xbf16, #tpu.memory_space<vmem>>, vector<1x64x128xbf16>
    %46 = vector.shape_cast %45 : vector<1x64x128xbf16> to vector<64x128xbf16>
    %47 = vector.shape_cast %44 : vector<64x128xbf16> to vector<1x64x128xbf16>
    tpu.vector_store %arg6[%c0_24, %c0_25, %c0_26], %47 {strides = array<i32>} : memref<1x64x128xbf16, #tpu.memory_space<vmem>>, vector<1x64x128xbf16>,
    return
  }
  func.func @transform_0(%arg0: i32, %arg1: i32) -> (i32, i32, i32) {
    %c0_i32 = arith.constant 0 : i32
    %c0_i32_0 = arith.constant 0 : i32
    %c0_i32_1 = arith.constant 0 : i32
    return %arg0, %c0_i32, %c0_i32_0 : i32, i32, i32
  }
  func.func @transform_1(%arg0: i32, %arg1: i32) -> (i32, i32, i32) {
    %c0_i32 = arith.constant 0 : i32
    %c0_i32_0 = arith.constant 0 : i32
    %c0_i32_1 = arith.constant 0 : i32
    %c0_i32_2 = arith.constant 0 : i32
    return %c0_i32, %c0_i32_0, %c0_i32_1 : i32, i32, i32
  }
  func.func @transform_2(%arg0: i32, %arg1: i32) -> (i32, i32) {
    %c0_i32 = arith.constant 0 : i32
    %c0_i32_0 = arith.constant 0 : i32
    %c0_i32_1 = arith.constant 0 : i32
    return %c0_i32, %c0_i32_0 : i32, i32
  }
  func.func @transform_3(%arg0: i32, %arg1: i32) -> (i32, i32) {
    %c0_i32 = arith.constant 0 : i32
    %c0_i32_0 = arith.constant 0 : i32
    %c0_i32_1 = arith.constant 0 : i32
    return %c0_i32, %c0_i32_0 : i32, i32
  }
  func.func @transform_4(%arg0: i32, %arg1: i32) -> (i32, i32, i32) {
    %c0_i32 = arith.constant 0 : i32
    %c0_i32_0 = arith.constant 0 : i32
    return %arg0, %arg1, %c0_i32 : i32, i32, i32
  }
}

</mosaic_0001>

<bundles_post_ra>
// kernel: tpu_custom_call.1
= control target key start
LH: loop header
LB: loop body
LE: loop exit
PB: predicated region body
PF: predicated region fallthrough
CT: control target
= control target key end

     0   :  { %11 = vsyncpa [#allocation4], 0  ;;  %s1841_s0 = inlined_call_operand.vmem [shape: bf16[2,70,1], index: 0, kind: input, shape index: {}]   ;;  %s1842_s1 = inlined_call_operand.vmem [shape: bf16[7,1,128], index: 1, kind: input, shape index: {}]   ;;  %s1843_s2 = inlined_call_operand.vmem [shape: f32[1,128], index: 2, kind: input, shape index: {}]   ;;  %s1844_s3 = inlined_call_operand.<no memory space> [shape: f32[1,1], index: 3, kind: input, shape index: {}]   ;;  %s1845_s4 = inlined_call_operand.hbm [shape: bf16[2,64,128], index: 4, kind: output, shape index: {}]  }
   0x1   :  { %13 = vsyncpa [#allocation4 + $0x1], 0  ;;  %s1539_s15 = smov 0   ;;  %s1541_s16 = smov 0  }
   0x2   :  { %s1543_s17 = smov 0   ;;  %s1545_s18 = smov 0  }
   0x3   :  { %s1547_s19 = smov 0   ;;  %s1549_s20 = smov 0  }
   0x4 LB: > { %s1119_s3 = sadd.s32 4294967295, %s1508_s20   ;;  %s1120_s21 = sadd.s32 4294967294, %s1508_s20   ;;  %s1508_s20 = sphi %s1549_s20, %s19_s20   ;;  %s1504_s19 = sphi %s1547_s19, %s1852_s19   ;;  %s1500_s18 = sphi %s1545_s18, %s1851_s18   ;;  %s1496_s17 = sphi %s1543_s17, %s1850_s17   ;;  %s1492_s16 = sphi %s1541_s16, %s1849_s16   ;;  %s1488_s15 = sphi %s1539_s15, %s1848_s15  }
   0x5   : > { %s31_s22 = sadd.s32 1, %s1504_s19  ;;  %s129_s23 = sadd.s32 1, %s1496_s17 }
   0x6   : > { %p33_p0 = scmp.ge.s32.totalorder %s31_s22, 2  ;;  %p139_p1 = scmp.ne.s32.totalorder %s1496_s17, %s1492_s16 }
   0x7   : > { %p140_p2 = scmp.eq.s32.totalorder %s1119_s3, 1  ;;  %p145_p3 = scmp.ne.s32.totalorder %s1492_s16, %s1488_s15 }
   0x8   : > { %s1854_s22 = smov (%p33_p0, %s31_s22), 0  ;;  %p146_p5 = scmp.eq.s32.totalorder %s1120_s21, 1 }
   0x9   : > { %p1579_p4 = por %p140_p2, %p139_p1  ;;  %s124_s25 = ssub.s32 %s1504_s19, %s1854_s22 }
   0xa   : > { %p1123_p6 = scmp.ge.s32.totalorder %s1508_s20, 1  ;;  %p127_p7 = scmp.eq.s32.totalorder %s124_s25, 0 }
   0xb   : > { %p1586_p8 = por %p146_p5, %p145_p3  ;;  %p181_p9 = scmp.lt.s32.totalorder %s1508_s20, 3 }
   0xc   : > { %s1592_s27 = scalar_select %p127_p7, %s1496_s17, %s129_s23  }
   0xd   : > { %p182_p10 = pnand %p1123_p6, %p181_p9 }
   0xe   : > { %v1126_v0 = vld [vmem:[%s1842_s1 + $0x1] sm:$0x1] (!%p182_p10)  ;;  %vm304_vm0 = vcmask (!%p182_p10), 1040384   ;;  %v1145_v1 = vld [vmem:[%s1842_s1 + $0x3] sm:$0x1] (!%p182_p10)  ;;  %v1510_v2 = vmov (!%p182_p10), 0  }
   0xf   : > { %185 = sbr.rel (%p182_p10) target bundleno = 325 (0x145), region = 36  ;;  %v1600_v3 = vsel (!%p182_p10), %vm304_vm0, 65535, %v1510_v2  ;;  %p207_p11 = scmp.lt.s32.totalorder (!%p182_p10), %s1500_s18, 1  ;;  %v228_v6 = vld [vmem:[%s1842_s1] sm:$0x1] (!%p182_p10)  ;;  %vm291_vm2 = vcmask (!%p182_p10), 7168  }
  0x10   : > { %v308_v4 = vand.u32 (!%p182_p10), %v1126_v0, %v1600_v3  ;;  %v1605_v5 = vand.u32 (!%p182_p10), %v1145_v1, %v1600_v3  ;;  %v1150_v7 = vld [vmem:[%s1842_s1 + $0x4] sm:$0x1] (!%p182_p10)  ;;  %v384_v8 = vand.u32 (!%p182_p10), %v1600_v3, %v228_v6  ;;  %vm254_vm1 = vsmask.f32 (!%p182_p10), 7424  ;;  %v1155_v34 = vld [vmem:[%s1842_s1 + $0x5] sm:$0x1] (!%p182_p10) }
  0x11   : > { %v1616_v9 = vand.u32 (!%p182_p10), %v1150_v7, %v1600_v3  ;;  %vm553_vm3 = vsmask.f32 (!%p182_p10), 6400  ;;  %vm665_vm4 = vcmask (!%p182_p10), 1045504   ;;  %v1140_v39 = vld [vmem:[%s1842_s1 + $0x2] sm:$0x1] (!%p182_p10)  ;;  %v798_v47 = vand.u32 (!%p182_p10), %v1155_v34, %v1600_v3  ;;  %s204_s30 = sand.u32 (!%p182_p10), 1, %s1492_s16  }
  0x12   : > { %1246 = vmatprep.subr.bf16.mxu1 (!%p182_p10), %v308_v4  ;;  %1276 = vmatprep.subr.bf16.mxu0 (!%p182_p10), %v1605_v5  ;;  %v476_v49 = vand.u32 (!%p182_p10), %v1140_v39, %v1600_v3  ;;  %v1160_v57 = vld [vmem:[%s1842_s1 + $0x6] sm:$0x1] (!%p182_p10)  ;;  %vm765_vm5 = vsmask.f32 (!%p182_p10), 5376  ;;  %vm453_vm6 = vcmask (!%p182_p10), 1046528   ;;  %vm875_vm7 = vcmask (!%p182_p10), 1044480  }
  0x13   : > { %1247 = vmatpush3.bf16.msra.mxu1 (!%p182_p10), %v308_v4  ;;  %1277 = vmatpush3.bf16.msra.mxu0 (!%p182_p10), %v1605_v5  ;;  %v898_v60 = vand.u32 (!%p182_p10), %v1160_v57, %v1600_v3  ;;  %s1124_s7 = sshll.u32 (!%p182_p10), %s204_s30, 5  ;;  %s1511_s3 = smov (!%p182_p10), [#allocation3]  }
  0x14   : > { %1256 = vmatprep.subr.bf16.mxu1 (!%p182_p10), %v384_v8  ;;  %1286 = vmatprep.subr.bf16.mxu0 (!%p182_p10), %v1616_v9  ;;  %s206_s8 = scalar_lea.vmem (!%p182_p10), [#allocation3], %s1124_s7  ;;  %s1434_s21 = sshll.u32 (!%p182_p10), %s1511_s3, 4  ;;  %s1435_s21 = int_to_ptr.vmem [resolvable:$false] %s1434_s21 }
  0x15   : > { %s1044_s9 = sshll.u32 (!%p182_p10), %s206_s8, 4  ;;  %s1436_s23 = scalar_lea.vmem (!%p182_p10), %s1435_s21, 1024  ;;  %s1786_s9 = int_to_ptr.vmem [resolvable:$true] %s1044_s9 }
  0x16   : > { %s208_s10 = scalar_select %p207_p11, %s1500_s18, 1 }
  0x17   : > { %p1437_p1 = scmp.lt.s32.totalorder %s1786_s9, %s1435_s21 }
  0x18   : > { %s1366_s11 = smul.u32 36, %s208_s10  ;;  %s1187_s10 = sshll.u32 %s1500_s18, 9 }
  0x19   : > { %s1791_s13 = scalar_lea.hbm %s1845_s4, %s1187_s10  ;;  %s1795_s18 = scalar_lea.sflag [#allocation4], %s204_s30 }
  0x1a   : > { %s211_s14 = scalar_lea.vmem %s1841_s0, %s1366_s11 }
  0x1b   : > { %v1624_v10 = vld [vmem:[%s211_s14] sm:$0xff]   ;;  %v1626_v11 = vld [vmem:[%s211_s14 + $0x8] sm:$0xff]   ;;  %v1628_v12 = vld [vmem:[%s211_s14 + $0x10] sm:$0xff]  }
  0x1c   : > { %v1631_v13 = vshrl.u32 %v1624_v10, 16  ;;  %v1634_v14 = vshll.u32 %v1624_v10, 16  ;;  %v1637_v15 = vshll.u32 %v1626_v11, 16  ;;  %v1640_v16 = vshrl.u32 %v1626_v11, 16  ;;  %v1648_v19 = vld [vmem:[%s211_s14 + $0x18] sm:$0xff]  }
  0x1d   : > { %v1643_v17 = vshll.u32 %v1628_v12, 16  ;;  %v1646_v18 = vshrl.u32 %v1628_v12, 16  ;;  %v666_v20 = vrot.slane %v1624_v10, 2  ;;  %v1662_v33 = vld [vmem:[%s211_s14 + $0x20] ss:$0 sps:$4 sm:$0x77]  }
  0x1e   : > { %v260_v21 = vrot.slane %v1634_v14, 1  ;;  %v265_v22 = vrot.slane %v1637_v15, 1  ;;  %v554_v23 = vrot.slane %v1631_v13, 1  ;;  %v555_v24 = vrot.slane %v1634_v14, 2  ;;  %s1430_s14 = scalar_lea.vmem %s1786_s9, 512 }
  0x1f   : > { %v557_v25 = vrot.slane %v1640_v16, 1  ;;  %v558_v26 = vrot.slane %v1637_v15, 2  ;;  %v273_v27 = vrot.slane %v1643_v17, 1  ;;  %v561_v28 = vrot.slane %v1646_v18, 1  ;;  %p1431_p12 = scmp.ne.s32.totalorder %s1786_s9, %s1430_s14  ;;  %p1438_p2 = scmp.lt.s32.totalorder %s1436_s23, %s1430_s14 }
  0x20   : > { %v261_v29 = vor.u32 %v260_v21, %v1631_v13  ;;  %v269_v30 = vor.u32 %v1640_v16, %v265_v22  ;;  %v556_v31 = vor.u32 %v555_v24, %v554_v23  ;;  %v562_v32 = vrot.slane %v1643_v17, 2 }
  0x21   : > { %v559_v35 = vor.u32 %v558_v26, %v557_v25  ;;  %v277_v36 = vor.u32 %v1646_v18, %v273_v27  ;;  %v1669_v37 = vshll.u32 %v1648_v19, 16  ;;  %v1672_v38 = vshrl.u32 %v1648_v19, 16  ;;  %p1432_p13 = pnand %p1431_p12, %p1579_p4  ;;  %p1439_p3 = por %p1438_p2, %p1437_p1 }
  0x22   : > { %v266_v40 = vsel %vm254_vm1, %v261_v29, %v265_v22  ;;  %v274_v41 = vsel %vm254_vm1, %v269_v30, %v273_v27  ;;  %v1679_v42 = vor.u32 %v562_v32, %v561_v28  ;;  %v1682_v43 = vshll.u32 %v1662_v33, 16 }
  0x23   : > { %1248 = vmatprep.mubr.msk.bf16.mxu1 %vm291_vm2, %v266_v40  ;;  %v560_v44 = vsel %vm553_vm3, %v556_v31, %v559_v35  ;;  %v281_v45 = vrot.slane %v1669_v37, 1  ;;  %v667_v46 = vrot.slane %v1626_v11, 2  ;;  %v669_v55 = vrot.slane %v1628_v12, 2  ;;  %p1433_p0 = pneg %p1432_p13 }
  0x24   : > { %1278 = vmatprep.mubr.msk.bf16.mxu0 %vm291_vm2, %v560_v44  ;;  %1249 = vmatmul.mubr.msk.bf16.vlgmr.msra.gmra.mrb[0].mxu1 %vm291_vm2, %v274_v41  ;;  %v564_v48 = vsel %vm553_vm3, %v559_v35, %v1679_v42  ;;  %v289_v52 = vrot.slane %v1682_v43, 1  ;;  %v671_v56 = vrot.slane %v1648_v19, 2  ;;  %v766_v59 = vrot.slane %v1631_v13, 2 }
  0x25   : > { %1257 = vmatpush3.bf16.msra.mxu1 %v384_v8  ;;  %1279 = vmatmul.mubr.msk.bf16.vlgmr.msra.gmra.mrb[0].mxu0 %vm291_vm2, %v564_v48  ;;  %v282_v50 = vsel %vm254_vm1, %v277_v36, %v281_v45  ;;  %v285_v51 = vor.u32 %v1672_v38, %v281_v45  ;;  %v668_v53 = vsel %vm665_vm4, %v666_v20, %v667_v46  ;;  %v767_v62 = vrot.slane %v1634_v14, 3  ;;  %p1440_p5 = pnand %p1439_p3, %p1433_p0 }
  0x26   : > { %1287 = vmatpush3.bf16.msra.mxu0 %v1616_v9  ;;  %1252 = vmatprep.mubr.msk.bf16.mxu1 %vm291_vm2, %v282_v50  ;;  %v670_v58 = vsel %vm665_vm4, %v667_v46, %v669_v55  ;;  %v672_v61 = vsel %vm665_vm4, %v669_v55, %v671_v56  ;;  %v769_v63 = vrot.slane %v1640_v16, 2  ;;  %v770_v0 = vrot.slane %v1637_v15, 3 }
  0x27   : > { %1288 = vmatprep.mubr.msk.bf16.mxu0 %vm291_vm2, %v668_v53  ;;  %1296 = vmatprep.subr.bf16.mxu0 %v798_v47  ;;  %v290_v54 = vsel %vm254_vm1, %v285_v51, %v289_v52  ;;  %v673_v1 = vrot.slane %v1662_v33, 2  ;;  %v768_v2 = vor.u32 %v767_v62, %v766_v59  ;;  %v773_v6 = vrot.slane %v1646_v18, 2 }
  0x28   : > { %1266 = vmatprep.subr.bf16.mxu1 %v476_v49  ;;  %v771_v4 = vor.u32 %v770_v0, %v769_v63  ;;  %v774_v7 = vrot.slane %v1643_v17, 3  ;;  %v454_v8 = vrot.slane %v1624_v10, 1  ;;  %v455_v9 = vrot.slane %v1626_v11, 1 }
  0x29   : > { %v674_v3 = vsel %vm665_vm4, %v671_v56, %v673_v1  ;;  %v777_v14 = vrot.slane %v1672_v38, 2  ;;  %v778_v15 = vrot.slane %v1669_v37, 3  ;;  %v569_v18 = vshrl.u32 %v1662_v33, 16 }
  0x2a   : > { %v772_v13 = vsel %vm765_vm5, %v768_v2, %v771_v4  ;;  %v775_v16 = vor.u32 %v774_v7, %v773_v6  ;;  %v456_v17 = vsel %vm453_vm6, %v454_v8, %v455_v9  ;;  %v457_v21 = vrot.slane %v1628_v12, 1 }
  0x2b   : > { %v779_v20 = vor.u32 %v778_v15, %v777_v14  ;;  %v781_v23 = vrot.slane %v569_v18, 2  ;;  %v782_v24 = vrot.slane %v1682_v43, 3  ;;  %v459_v25 = vrot.slane %v1648_v19, 1 }
  0x2c   : > { %1253 = vmatmul.mubr.msk.bf16.gmra.mrb[4].mxu1 %vm291_vm2, %v290_v54  ;;  %v776_v22 = vsel %vm765_vm5, %v771_v4, %v775_v16  ;;  %v458_v27 = vsel %vm453_vm6, %v455_v9, %v457_v21  ;;  %v565_v30 = vrot.slane %v1672_v38, 1  ;;  %v566_v31 = vrot.slane %v1669_v37, 2 }
  0x2d   : > { %1258 = vmatprep.mubr.msk.bf16.mxu1 %vm291_vm2, %v1624_v10  ;;  %v780_v26 = vsel %vm765_vm5, %v775_v16, %v779_v20  ;;  %v783_v28 = vor.u32 %v782_v24, %v781_v23  ;;  %v460_v29 = vsel %vm453_vm6, %v457_v21, %v459_v25  ;;  %v876_v32 = vrot.slane %v1624_v10, 3 }
  0x2e   : > { %v877_v34 = vrot.slane %v1626_v11, 3  ;;  %v461_v35 = vrot.slane %v1662_v33, 1  ;;  %v567_v39 = vor.u32 %v566_v31, %v565_v30  ;;  %v881_v37 = vrot.slane %v1648_v19, 3 }
  0x2f   : > { %v784_v36 = vsel %vm765_vm5, %v779_v20, %v783_v28  ;;  %v571_v40 = vrot.slane %v569_v18, 1  ;;  %v572_v41 = vrot.slane %v1682_v43, 2 }
  0x30   : > { %v878_v38 = vsel %vm875_vm7, %v876_v32, %v877_v34  ;;  %v462_v10 = vsel %vm453_vm6, %v459_v25, %v461_v35 }
  0x31   : > { %1289 = vmatmul.mubr.msk.bf16.vlgmr.msra.gmra.mrb[0].mxu0 %vm291_vm2, %v670_v58 }
  0x32   : > { %1297 = vmatpush3.bf16.msra.mxu0 %v798_v47  ;;  %1292 = vmatprep.mubr.msk.bf16.mxu0 %vm291_vm2, %v672_v61 }
  0x33   : > { %1306 = vmatprep.subr.bf16.mxu0 %v898_v60 }
  0x34   : > { %1259 = vmatmul.mubr.msk.bf16.vlgmr.msra.gmra.mrb[0].mxu1 %vm291_vm2, %v1626_v11  ;;  %v879_v11 = vrot.slane %v1628_v12, 3 }
  0x35   : > { %1267 = vmatpush3.bf16.msra.mxu1 %v476_v49  ;;  %1262 = vmatprep.mubr.msk.bf16.mxu1 %vm291_vm2, %v1628_v12  ;;  %v573_v12 = vor.u32 %v572_v41, %v571_v40 }
  0x36   : > { %1316 = vmatprep.subr.bf16.mxu1 %v1605_v5  ;;  %v880_v44 = vsel %vm875_vm7, %v877_v34, %v879_v11  ;;  %v882_v45 = vsel %vm875_vm7, %v879_v11, %v881_v37 }
  0x39   : > { %1293 = vmatmul.mubr.msk.bf16.gmra.mrb[4].mxu0 %vm291_vm2, %v674_v3 }
  0x3a   : > { %1298 = vmatprep.mubr.msk.bf16.mxu0 %vm291_vm2, %v772_v13 }
  0x3c   : > { %1263 = vmatmul.mubr.msk.bf16.gmra.mrb[4].mxu1 %vm291_vm2, %v1648_v19  ;;  %v574_v19 = vsel %vm553_vm3, %v567_v39, %v573_v12 }
  0x3d   : > { %1268 = vmatprep.mubr.msk.bf16.mxu1 %vm291_vm2, %v456_v17 }
  0x41   : > { %1299 = vmatmul.mubr.msk.bf16.vlgmr.msra.gmra.mrb[0].mxu0 %vm291_vm2, %v776_v22 }
  0x42   : > { %1307 = vmatpush3.bf16.msra.mxu0 %v898_v60  ;;  %1302 = vmatprep.mubr.msk.bf16.mxu0 %vm291_vm2, %v780_v26 }
  0x44   : > { %1269 = vmatmul.mubr.msk.bf16.vlgmr.msra.gmra.mrb[0].mxu1 %vm291_vm2, %v458_v27 }
  0x45   : > { %1317 = vmatpush3.bf16.msra.mxu1 %v1605_v5  ;;  %1272 = vmatprep.mubr.msk.bf16.mxu1 %vm291_vm2, %v460_v29  ;;  %v568_v5 = vsel %vm553_vm3, %v1679_v42, %v567_v39  ;;  %v883_v42 = vrot.slane %v1662_v33, 3  ;;  %v1165_v33 = vld [vmem:[%s1843_s2] ss:$0 sm:$0xff] }
  0x47   : > { %v884_v46 = vsel %vm875_vm7, %v881_v37, %v883_v42 }
  0x49   : > { %1303 = vmatmul.mubr.msk.bf16.gmra.mrb[4].mxu0 %vm291_vm2, %v784_v36 }
  0x4a   : > { %1308 = vmatprep.mubr.msk.bf16.mxu0 %vm291_vm2, %v878_v38 }
  0x4c   : > { %1273 = vmatmul.mubr.msk.bf16.gmra.mrb[4].mxu1 %vm291_vm2, %v462_v10 }
  0x4d   : > { %1282 = vmatprep.mubr.msk.bf16.mxu1 %vm291_vm2, %v568_v5 }
  0x51   : > { %1309 = vmatmul.mubr.msk.bf16.vlgmr.msra.gmra.mrb[0].mxu0 %vm291_vm2, %v880_v44 }
  0x52   : > { %1312 = vmatprep.mubr.msk.bf16.mxu0 %vm291_vm2, %v882_v45 }
  0x58   : > { %1283 = vmatmul.mubr.msk.bf16.vlgmr.msra.gmra.mrb[4].mxu1 %vm291_vm2, %v574_v19 }
  0x59   : > { %1313 = vmatmul.mubr.msk.bf16.gmra.mrb[4].mxu0 %vm291_vm2, %v884_v46 }
 0x117   : > { %v1270_v43 = vpop.f32.mrb[0].mxu1 }
 0x118   : > { %v512_v47 = vpop.f32.mrb[1].mxu1 }
 0x119   : > { %v1271_v48 = vpop.f32.mrb[2].mxu1 }
 0x11a   : > { %v515_v49 = vpop.f32.mrb[3].mxu1 }
 0x124   : > { %v1310_v50 = vpop.f32.mrb[0].mxu0 }
 0x125   : > { %v1318_v51 = vadd.f32 %v1310_v50, %v1270_v43  ;;  %v934_v52 = vpop.f32.mrb[1].mxu0 }
 0x126   : > { %v1319_v53 = vadd.f32 %v934_v52, %v512_v47  ;;  %v1311_v54 = vpop.f32.mrb[2].mxu0 }
 0x127   : > { %v1320_v55 = vadd.f32 %v1311_v54, %v1271_v48  ;;  %v937_v56 = vpop.f32.mrb[3].mxu0  ;;  %v982_v58 = vadd.f32 %v1318_v51, %v1165_v33 }
 0x128   : > { %v1321_v57 = vadd.f32 %v937_v56, %v515_v49  ;;  %v980_v60 = vadd.f32 %v1319_v53, %v1165_v33 }
 0x129   : > { %v983_v59 = vadd.f32 %v1320_v55, %v1165_v33 }
 0x12a   : > { %v981_v61 = vadd.f32 %v1321_v57, %v1165_v33 }
 0x12b   : > { %v1196_v62 = vpack.c.bf16 %v983_v59, %v982_v58  ;;  %v1284_v63 = vpop.f32.mrb[4].mxu1 }
 0x12c   : > { %v1191_v0 = vpack.c.bf16 %v981_v61, %v980_v60  ;;  %v1314_v1 = vpop.f32.mrb[4].mxu0  ;;  %v640_v2 = vpop.f32.mrb[5].mxu1 }
 0x12d   : > { %1208 = vst [vmem:[%s206_s8 + $0x8] sm:$0xff] %v1196_v62   ;;  %v1322_v4 = vadd.f32 %v1314_v1, %v1284_v63  ;;  %v950_v3 = vpop.f32.mrb[5].mxu0  ;;  %v1285_v6 = vpop.f32.mrb[6].mxu1 }
 0x12e   : > { %1192 = vst [vmem:[%s206_s8] sm:$0xff] %v1191_v0   ;;  %v1323_v7 = vadd.f32 %v950_v3, %v640_v2  ;;  %v1315_v8 = vpop.f32.mrb[6].mxu0  ;;  %v643_v9 = vpop.f32.mrb[7].mxu1 }
 0x12f   : > { %v1324_v13 = vadd.f32 %v1315_v8, %v1285_v6  ;;  %v953_v14 = vpop.f32.mrb[7].mxu0  ;;  %v986_v16 = vadd.f32 %v1322_v4, %v1165_v33 }
 0x130   : > { %v1325_v15 = vadd.f32 %v953_v14, %v643_v9  ;;  %v984_v18 = vadd.f32 %v1323_v7, %v1165_v33 }
 0x131   : > { %v987_v17 = vadd.f32 %v1324_v13, %v1165_v33 }
 0x132   : > { %v985_v20 = vadd.f32 %v1325_v15, %v1165_v33 }
 0x133   : > { %v1206_v21 = vpack.c.bf16 %v987_v17, %v986_v16 }
 0x134   : > { %v1201_v22 = vpack.c.bf16 %v985_v20, %v984_v18 }
 0x135   : > { %1210 = vst [vmem:[%s206_s8 + $0x18] sm:$0xff] %v1206_v21  }
 0x136   : > { %1209 = vst [vmem:[%s206_s8 + $0x10] sm:$0xff] %v1201_v22  }
 0x137   : > { %1443 = shalt.err (!%p1440_p5)
}
 0x138   : > { %s1444_s25 = scalar_lea.hbm %s1791_s13, 512  ;;  %s1448_s30 = scalar_lea.hbm %s1845_s4, 1024 }
 0x139   : > { %p1445_p6 = scmp.ne.s32.totalorder %s1791_s13, %s1444_s25  ;;  %p1449_p10 = scmp.lt.u32.totalorder %s1791_s13, %s1845_s4 }
 0x13a   : > { %p1450_p11 = scmp.lt.u32.totalorder %s1448_s30, %s1444_s25  ;;  %p1452_p13 = scmp.lt.u32.totalorder %s1444_s25, %s1791_s13 }
 0x13b   : > { %p1446_p7 = pnand %p1445_p6, %p1579_p4 }
 0x13c   : > { %p1451_p12 = por %p1450_p11, %p1449_p10 }
 0x13d   : > { %p1447_p9 = pneg %p1446_p7 }
 0x13e   : > { %p1453_p0 = por %p1452_p13, %p1451_p12 }
 0x140   : > { %p1454_p1 = pnand %p1453_p0, %p1447_p9 }
 0x142   : > { %1457 = shalt.err (!%p1454_p1)
}
 0x143   : > { %s1512_s7 = smov 64   ;;  %s1513_s8 = smov 4  }
 0x144   : > { %1367 = dma.vmem_to_hbm [thread:$0]  (%p1579_p4), %s1786_s9, 512, %s1791_s13, %s1795_s18, %s1512_s7, %s1512_s7, %s1513_s8  }
 0x145 PF: > { %p1373_p2 = scmp.ge.s32.totalorder %s1508_s20, 2  ;;  %s1059_s10 = sand.u32 1, %s1488_s15  }
 0x146   : > { %s1060_s11 = scalar_lea.sflag [#allocation4], %s1059_s10 }
 0x147   : > { %p1370_p3 = pnand %p1373_p2, %p1586_p8 }
 0x149   : > { %1483 = dma.done.wait (!%p1370_p3), %s1060_s11, 512  }
 0x14a   : > { %1485 = vsyncadd (!%p1370_p3), %s1060_s11, 4294966784  ;;  %s19_s20 = sadd.s32 1, %s1508_s20   ;;  %s1848_s15 = smov %s1492_s16 }
 0x14b   : > { %p16_p5 = scmp.ge.s32.totalorder %s19_s20, 4   ;;  %s1849_s16 = smov %s1496_s17 }
 0x14c   : > { %s1850_s17 = smov %s1592_s27  ;;  %s1851_s18 = smov %s1504_s19 }
 0x14d   : > { %s1852_s19 = smov %s1854_s22  ;;  %18 = sbr.rel (!%p16_p5) target bundleno = 4 (0x4), region = 78 }
 0x154   :  { %1065 = vsyncpa [#allocation4], 1 }
 0x155   :  { %1067 = vsyncpa [#allocation4 + $0x1], 1 }

</bundles_post_ra>
